<compile_context>
chip_gen: v7x
topology: tpu7x:2x2x1
jax: 0.10.0
libtpu: 0.0.40
codegen_flags: <defaults>
</compile_context>

<pallas_src>
from functools import lru_cache, partial

import numpy as np
import jax
import jax.numpy as jnp
from jax.experimental import pallas as pl
from jax.experimental.pallas import tpu as pltpu


def _round_up(v: int, m: int) -> int:
    return (v + m - 1) // m * m


def _num_outputs(seq_len: int, kernel_size: int, stride: int) -> int:
    pad = (kernel_size - 1) // 2
    return (seq_len + 2 * pad - kernel_size) // stride + 1


@lru_cache(maxsize=None)
def _count_matrix(seq_len: int, kernel_size: int, stride: int,
                  out_rows: int, dtype_name: str):
    """Static (out_rows, seq_len) matrix of window multiplicities.

    Entry [t, s] = number of taps of output window t that land on input row s
    after edge-replication padding.  Counts are small integers -> exact in
    bf16, so the matmul can use the native MXU dtype while the 1/kernel_size
    scale is applied once in f32 after the f32 MXU accumulation.
    Cached per config; under jit the returned array folds into a constant.
    Rows beyond the true output length (row padding to a multiple of 8/16)
    are left zero and sliced off by the wrapper.
    """
    pad = (kernel_size - 1) // 2
    n_out = _num_outputs(seq_len, kernel_size, stride)
    t = np.arange(n_out)[:, None]                       # (n_out, 1)
    j = np.arange(kernel_size)[None, :]                 # (1, k)
    src = np.clip(t * stride + j - pad, 0, seq_len - 1)  # (n_out, k)
    a = np.zeros((out_rows, seq_len), np.float32)
    np.add.at(a, (np.broadcast_to(t, src.shape), src), np.float32(1.0))
    return jnp.asarray(a, dtype=jnp.dtype(dtype_name))


def _moving_avg_kernel(a_ref, x_ref, o_ref, *, batch_tile, row_tile, inv_k):
    # a_ref: (out_rows, L)            full count matrix, resident in VMEM
    # x_ref: (BT, L, c_tile)          batch tile of inputs, native dtype
    # o_ref: (BT, row_tile, c_tile)   one output row-band per step
    r = pl.program_id(2)
    start = pl.multiple_of(r * row_tile, 8)
    a = a_ref[pl.ds(start, row_tile), :]
    for bi in range(batch_tile):  # static unroll over the batch tile
        acc = jnp.dot(a, x_ref[bi], preferred_element_type=jnp.float32)
        o_ref[bi] = (acc * inv_k).astype(o_ref.dtype)


def moving_avg(x, kernel_size: int, stride: int):
    """Equivalent of MovingAvg(kernel_size, stride)(x) for x of shape (B, L, C)."""
    b, seq_len, c = x.shape
    n_out = _num_outputs(seq_len, kernel_size, stride)

    # Counts are exact in the input float dtype; accumulation is always f32.
    a_dtype = x.dtype if jnp.issubdtype(x.dtype, jnp.floating) else jnp.float32
    itemsize = jnp.dtype(x.dtype).itemsize

    # ---- channel tiling: lane-dense and as large as practical -------------
    c_pad = _round_up(c, 128)
    if c_pad <= 1024:
        c_tile = c_pad
    else:
        c_tile = next(ct for ct in (1024, 512, 256, 128) if c_pad % ct == 0)

    # ---- batch tiling: amortize per-grid-step overhead ---------------------
    per_batch_bytes = (seq_len + n_out) * c_tile * itemsize
    batch_tile = 1
    for bt in (8, 4, 2, 1):
        if b % bt == 0 and 2 * bt * per_batch_bytes <= (20 << 20):
            batch_tile = bt
            break
    nb = b // batch_tile
    nc = c_pad // c_tile

    # ---- output-row tiling: keep >=2 parallel steps for v7x megacore ------
    if nb * nc >= 2 or n_out < 16:
        out_rows = _round_up(n_out, 8)
        row_tile, n_row = out_rows, 1
    else:
        out_rows = _round_up(n_out, 16)
        row_tile, n_row = out_rows // 2, 2

    a = _count_matrix(seq_len, kernel_size, stride, out_rows,
                      jnp.dtype(a_dtype).name)
    x_in = x if c_pad == c else jnp.pad(x, ((0, 0), (0, 0), (0, c_pad - c)))

    # ---- right-sized VMEM limit (double-buffered blocks + f32 acc + slack) -
    a_bytes = out_rows * seq_len * jnp.dtype(a_dtype).itemsize
    x_blk = batch_tile * seq_len * c_tile * itemsize
    o_blk = batch_tile * row_tile * c_tile * itemsize
    acc_bytes = row_tile * c_tile * 4
    need = 2 * (a_bytes + x_blk + o_blk) + acc_bytes
    vmem_limit = min(max(int(need * 1.5) + (4 << 20), 16 << 20), 64 << 20)

    kernel = partial(_moving_avg_kernel,
                     batch_tile=batch_tile,
                     row_tile=row_tile,
                     inv_k=float(1.0 / kernel_size))

    out = pl.pallas_call(
        kernel,
        out_shape=jax.ShapeDtypeStruct((b, out_rows, c_pad), x.dtype),
        grid_spec=pltpu.PrefetchScalarGridSpec(
            num_scalar_prefetch=0,
            grid=(nb, nc, n_row),
            in_specs=[
                # A: constant block index -> fetched once, stays resident.
                pl.BlockSpec((out_rows, seq_len), lambda i, j, r: (0, 0)),
                # x: constant across the innermost row axis -> no re-fetch.
                pl.BlockSpec((batch_tile, seq_len, c_tile),
                             lambda i, j, r: (i, 0, j)),
            ],
            out_specs=pl.BlockSpec((batch_tile, row_tile, c_tile),
                                   lambda i, j, r: (i, r, j)),
        ),
        compiler_params=pltpu.CompilerParams(
            dimension_semantics=("parallel", "parallel", "parallel"),
            vmem_limit_bytes=vmem_limit,
        ),
    )(a, x_in)

    if out_rows != n_out or c_pad != c:
        out = out[:, :n_out, :c]
    return out


def _moving_avg_reference(x, kernel_size: int, stride: int):
    """Pure-JAX reference mirroring the PyTorch forward."""
    pad = (kernel_size - 1) // 2
    front = jnp.repeat(x[:, 0:1, :], pad, axis=1)
    end = jnp.repeat(x[:, -1:, :], pad, axis=1)
    xp = jnp.concatenate([front, x, end], axis=1)
    n_out = (xp.shape[1] - kernel_size) // stride + 1
    outs = [jnp.mean(xp[:, t * stride:t * stride + kernel_size, :], axis=1)
            for t in range(n_out)]
    return jnp.stack(outs, axis=1)


if __name__ == "__main__":
    key = jax.random.PRNGKey(0)
    B, L, C = 2, 16, 8
    x = jax.random.normal(key, (B, L, C), dtype=jnp.float32)

    # Case 1: typical Autoformer config (odd kernel, stride 1) -- exercises
    # the batch-tile + output-row-tile path (grid (1,1,2)).
    out = jax.block_until_ready(moving_avg(x, kernel_size=5, stride=1))
    ref = _moving_avg_reference(x, kernel_size=5, stride=1)
    assert out.shape == ref.shape, (out.shape, ref.shape)
    assert jnp.allclose(out, ref, atol=1e-5, rtol=1e-5), "mismatch (k=5, s=1)"

    # Case 2: even kernel + stride>1 (edge-weight / strided window path).
    out2 = jax.block_until_ready(moving_avg(x, kernel_size=4, stride=2))
    ref2 = _moving_avg_reference(x, kernel_size=4, stride=2)
    assert out2.shape == ref2.shape, (out2.shape, ref2.shape)
    assert jnp.allclose(out2, ref2, atol=1e-5, rtol=1e-5), "mismatch (k=4, s=2)"

    # Case 3: bf16 input -- native bf16 MXU path with exact integer-count A
    # and f32 accumulation / f32 1/k epilogue scale.
    x_bf = x.astype(jnp.bfloat16)
    out3 = jax.block_until_ready(moving_avg(x_bf, kernel_size=5, stride=1))
    ref3 = _moving_avg_reference(x_bf.astype(jnp.float32), kernel_size=5, stride=1)
    assert out3.shape == ref3.shape, (out3.shape, ref3.shape)
    assert jnp.allclose(out3.astype(jnp.float32), ref3, atol=3e-2, rtol=3e-2), \
        "mismatch (bf16)"

    print("KERNEL_OK")
</pallas_src>

<mosaic_0001>
module attributes {stable_mosaic.version = 11 : i64} {
  func.func @_moving_avg_kernel(%arg0: i32, %arg1: i32, %arg2: i32, %arg3: memref<16x16xf32, #tpu.memory_space<vmem>>, %arg4: memref<2x16x128xf32, #tpu.memory_space<vmem>>, %arg5: memref<2x8x128xf32, #tpu.memory_space<vmem>>) attributes {dimension_semantics = [#tpu.dimension_semantics<parallel>, #tpu.dimension_semantics<parallel>, #tpu.dimension_semantics<parallel>], iteration_bounds = array<i64: 1, 1, 2>, scalar_prefetch = 0 : i64, scratch_operands = 0 : i64, tpu.core_type = #tpu.core_type<tc>, window_params = [{pipeline_mode = #tpu.pipeline_mode<synchronous>, transform_indices = @transform_0, window_bounds = array<i64: 16, 16>}, {transform_indices = @transform_1, window_bounds = array<i64: 2, 16, 128>}, {transform_indices = @transform_2, window_bounds = array<i64: 2, 8, 128>}]} {
    %c8_i32 = arith.constant 8 : i32
    %0 = arith.muli %arg2, %c8_i32 : i32
    %1 = tpu.assume_multiple %0, 8 : i32
    %2 = arith.index_cast %1 : i32 to index
    %c0 = arith.constant 0 : index
    %3 = vector.load %arg3[%2, %c0] : memref<16x16xf32, #tpu.memory_space<vmem>>, vector<8x16xf32>
    %c0_0 = arith.constant 0 : index
    %c0_1 = arith.constant 0 : index
    %c0_2 = arith.constant 0 : index
    %4 = vector.load %arg4[%c0_0, %c0_1, %c0_2] : memref<2x16x128xf32, #tpu.memory_space<vmem>>, vector<1x16x128xf32>
    %5 = vector.shape_cast %4 : vector<1x16x128xf32> to vector<16x128xf32>
    %cst = arith.constant dense<0.000000e+00> : vector<8x128xf32>
    %6 = tpu.matmul %3, %5, %cst {dimension_numbers = #tpu.dot_dimension_numbers<[1], [0], [0], [1], [0, 0, 1, 1], [], []>} : vector<8x16xf32>, vector<16x128xf32>, vector<8x128xf32> -> vector<8x128xf32>
    %cst_3 = arith.constant 2.000000e-01 : f32
    %7 = vector.broadcast %cst_3 : f32 to vector<8x128xf32>
    %8 = arith.mulf %6, %7 : vector<8x128xf32>
    %c0_4 = arith.constant 0 : index
    %c0_5 = arith.constant 0 : index
    %c0_6 = arith.constant 0 : index
    %9 = vector.load %arg5[%c0_4, %c0_5, %c0_6] : memref<2x8x128xf32, #tpu.memory_space<vmem>>, vector<1x8x128xf32>
    %10 = vector.shape_cast %9 : vector<1x8x128xf32> to vector<8x128xf32>
    %11 = vector.shape_cast %8 : vector<8x128xf32> to vector<1x8x128xf32>
    tpu.vector_store %arg5[%c0_4, %c0_5, %c0_6], %11 {strides = array<i32>} : memref<2x8x128xf32, #tpu.memory_space<vmem>>, vector<1x8x128xf32>,
    %c1 = arith.constant 1 : index
    %c0_7 = arith.constant 0 : index
    %c0_8 = arith.constant 0 : index
    %12 = vector.load %arg4[%c1, %c0_7, %c0_8] : memref<2x16x128xf32, #tpu.memory_space<vmem>>, vector<1x16x128xf32>
    %13 = vector.shape_cast %12 : vector<1x16x128xf32> to vector<16x128xf32>
    %cst_9 = arith.constant dense<0.000000e+00> : vector<8x128xf32>
    %14 = tpu.matmul %3, %13, %cst_9 {dimension_numbers = #tpu.dot_dimension_numbers<[1], [0], [0], [1], [0, 0, 1, 1], [], []>} : vector<8x16xf32>, vector<16x128xf32>, vector<8x128xf32> -> vector<8x128xf32>
    %cst_10 = arith.constant 2.000000e-01 : f32
    %15 = vector.broadcast %cst_10 : f32 to vector<8x128xf32>
    %16 = arith.mulf %14, %15 : vector<8x128xf32>
    %c1_11 = arith.constant 1 : index
    %c0_12 = arith.constant 0 : index
    %c0_13 = arith.constant 0 : index
    %17 = vector.load %arg5[%c1_11, %c0_12, %c0_13] : memref<2x8x128xf32, #tpu.memory_space<vmem>>, vector<1x8x128xf32>
    %18 = vector.shape_cast %17 : vector<1x8x128xf32> to vector<8x128xf32>
    %19 = vector.shape_cast %16 : vector<8x128xf32> to vector<1x8x128xf32>
    tpu.vector_store %arg5[%c1_11, %c0_12, %c0_13], %19 {strides = array<i32>} : memref<2x8x128xf32, #tpu.memory_space<vmem>>, vector<1x8x128xf32>,
    return
  }
  func.func @transform_0(%arg0: i32, %arg1: i32, %arg2: i32) -> (i32, i32) {
    %c0_i32 = arith.constant 0 : i32
    %c0_i32_0 = arith.constant 0 : i32
    %c0_i32_1 = arith.constant 0 : i32
    return %c0_i32, %c0_i32_0 : i32, i32
  }
  func.func @transform_1(%arg0: i32, %arg1: i32, %arg2: i32) -> (i32, i32, i32) {
    %c0_i32 = arith.constant 0 : i32
    %c0_i32_0 = arith.constant 0 : i32
    return %arg0, %c0_i32, %arg1 : i32, i32, i32
  }
  func.func @transform_2(%arg0: i32, %arg1: i32, %arg2: i32) -> (i32, i32, i32) {
    %c0_i32 = arith.constant 0 : i32
    return %arg0, %arg2, %arg1 : i32, i32, i32
  }
}

</mosaic_0001>

<bundles_post_ra>
// kernel: tpu_custom_call.1
= control target key start
LH: loop header
LB: loop body
LE: loop exit
PB: predicated region body
PF: predicated region fallthrough
CT: control target
= control target key end

     0   :  { %7 = vsyncpa [#allocation3], 0  ;;  %s938_s0 = inlined_call_operand.hbm [shape: f32[16,16], index: 0, kind: input, shape index: {}]   ;;  %s939_s1 = inlined_call_operand.hbm [shape: f32[2,16,128], index: 1, kind: input, shape index: {}]   ;;  %s940_s2 = inlined_call_operand.hbm [shape: f32[2,16,128], index: 2, kind: output, shape index: {}]  }
   0x1   :  { %8 = vsyncpa [#allocation6], 0 }
   0x2   :  { %9 = vsyncpa [#allocation4], 0 }
   0x3   :  { %11 = vsyncpa [#allocation4 + $0x1], 0  ;;  %s752_s9 = smov 0   ;;  %s754_s10 = smov 0  }
   0x4   :  { %s756_s11 = smov 0   ;;  %s758_s12 = smov 0  }
   0x5   :  { %s760_s13 = smov 0   ;;  %s762_s14 = smov 0  }
   0x6 LB: > { %s455_s15 = sadd.s32 4294967295, %s724_s14   ;;  %s456_s16 = sadd.s32 4294967294, %s724_s14   ;;  %s724_s14 = sphi %s762_s14, %s17_s14   ;;  %s720_s13 = sphi %s760_s13, %s958_s13   ;;  %s716_s12 = sphi %s758_s12, %s957_s12   ;;  %s712_s11 = sphi %s756_s11, %s956_s11   ;;  %s708_s10 = sphi %s754_s10, %s955_s10   ;;  %s704_s9 = sphi %s752_s9, %s954_s9  }
   0x7   : > { %s29_s17 = sadd.s32 1, %s720_s13  ;;  %s96_s18 = sadd.s32 1, %s712_s11 }
   0x8   : > { %p30_p0 = scmp.ge.s32.totalorder %s29_s17, 2  ;;  %p106_p1 = scmp.ne.s32.totalorder %s712_s11, %s708_s10 }
   0x9   : > { %p107_p2 = scmp.eq.s32.totalorder %s455_s15, 1  ;;  %p112_p3 = scmp.ne.s32.totalorder %s708_s10, %s704_s9 }
   0xa   : > { %s960_s17 = smov (%p30_p0, %s29_s17), 0  ;;  %p113_p5 = scmp.eq.s32.totalorder %s456_s16, 1 }
   0xb   : > { %p792_p4 = por %p107_p2, %p106_p1  ;;  %s90_s20 = ssub.s32 %s720_s13, %s960_s17 }
   0xc   : > { %p457_p6 = scmp.ge.s32.totalorder %s724_s14, 1  ;;  %p94_p7 = scmp.eq.s32.totalorder %s90_s20, 0 }
   0xd   : > { %s945_s19 = scalar_select %p792_p4, 1, 0 }
   0xe   : > { %p799_p8 = por %p113_p5, %p112_p3  ;;  %p120_p9 = scmp.lt.s32.totalorder %s724_s14, 3 }
   0xf   : > { %s805_s22 = scalar_select %p94_p7, %s712_s11, %s96_s18  }
  0x10   : > { %s946_s21 = scalar_select %p799_p8, 1, 0 }
  0x11   : > { %p807_p10 = pnand %p457_p6, %p120_p9  ;;  %p811_p11 = scmp.eq.s32.totalorder %s455_s15, 0 }
  0x12   : > { %s726_s25 = smov [#allocation2]   ;;  %s727_s28 = smov [#allocation5]  }
  0x13   : > { %s947_s23 = scalar_select %p807_p10, 1, 0 }
  0x14   : > { %s948_s24 = scalar_select %p811_p11, 1, 0 }
  0x15   : > { %p508_p12 = pneg %p807_p10  ;;  %s132_s26 = sshll.u32 %s726_s25, 4  ;;  %s133_s26 = int_to_ptr.vmem [resolvable:$true] %s132_s26 }
  0x16   : > { %s150_s29 = sshll.u32 %s727_s28, 4  ;;  %s582_s4 = scalar_lea.hbm %s938_s0, 256  ;;  %s823_s29 = int_to_ptr.vmem [resolvable:$true] %s150_s29 }
  0x17   : > { %p819_p13 = pnand %p811_p11, %p508_p12  ;;  %p583_p0 = scmp.ne.s32.totalorder %s938_s0, %s582_s4 }
  0x18   : > { %p589_p5 = scmp.lt.u32.totalorder %s582_s4, %s938_s0 }
  0x19   : > { %p584_p1 = pneg %p819_p13 }
  0x1b   : > { %p585_p2 = pnand %p584_p1, %p583_p0 }
  0x1d   : > { %p586_p3 = pneg %p585_p2 }
  0x1f   : > { %p591_p6 = pnand %p589_p5, %p586_p3 }
  0x21   : > { %594 = shalt.err (!%p591_p6)
}
  0x22   : > { %s595_s15 = scalar_lea.vmem %s133_s26, 256  ;;  %p603_p8 = scmp.lt.s32.totalorder %s133_s26, %s133_s26 }
  0x23   : > { %p596_p7 = scmp.ne.s32.totalorder %s133_s26, %s595_s15  ;;  %p604_p4 = scmp.lt.s32.totalorder %s595_s15, %s595_s15 }
  0x25   : > { %p598_p9 = pnand %p596_p7, %p584_p1  ;;  %p605_p11 = por %p604_p4, %p603_p8 }
  0x27   : > { %p599_p12 = pneg %p598_p9 }
  0x29   : > { %p606_p10 = pnand %p605_p11, %p599_p12 }
  0x2b   : > { %609 = shalt.err (!%p606_p10)
}
  0x2c   : > { %s728_s16 = smov 128   ;;  %s729_s18 = smov 8  }
  0x2d   : > { %511 = dma.hbm_to_vmem [thread:$0]  (!%p819_p13), %s938_s0, 256, %s133_s26, [#allocation3], %s728_s16, %s728_s16, %s729_s18  }
  0x2e   : > { %s610_s3 = scalar_lea.hbm %s939_s1, 512 }
  0x2f   : > { %p611_p0 = scmp.ne.s32.totalorder %s939_s1, %s610_s3  ;;  %p617_p10 = scmp.lt.u32.totalorder %s610_s3, %s939_s1 }
  0x31   : > { %p613_p4 = pnand %p611_p0, %p584_p1 }
  0x33   : > { %p614_p8 = pneg %p613_p4 }
  0x35   : > { %p619_p11 = pnand %p617_p10, %p614_p8 }
  0x37   : > { %622 = shalt.err (!%p619_p11)
}
  0x38   : > { %s623_s26 = scalar_lea.vmem %s823_s29, 512  ;;  %p631_p6 = scmp.lt.s32.totalorder %s823_s29, %s823_s29 }
  0x39   : > { %p624_p2 = scmp.ne.s32.totalorder %s823_s29, %s623_s26  ;;  %p632_p7 = scmp.lt.s32.totalorder %s623_s26, %s623_s26 }
  0x3b   : > { %p626_p3 = pnand %p624_p2, %p584_p1  ;;  %p633_p9 = por %p632_p7, %p631_p6 }
  0x3d   : > { %p627_p5 = pneg %p626_p3 }
  0x3f   : > { %p634_p12 = pnand %p633_p9, %p627_p5 }
  0x41   : > { %637 = shalt.err (!%p634_p12)
}
  0x42   : > { %514 = dma.hbm_to_vmem [thread:$0]  (!%p819_p13), %s939_s1, 512, %s823_s29, [#allocation6], %s728_s16, %s728_s16, %s729_s18  }
  0x43   : > { %p950_p0 = scmp.ne.s32.totalorder %s947_s23, 0 }
  0x44   : > { %p951_p4 = scmp.ne.s32.totalorder (!%p950_p0), %s948_s24, 0 }
  0x45   : > { %166 = sbr.rel (%p950_p0) target bundleno = 317 (0x13d), region = 28 }
  0x4c   : > { %691 = dma.done.wait (%p951_p4), [#allocation3], 256  }
  0x4d   : > { %693 = vsyncadd (%p951_p4), [#allocation3], 4294967040 }
  0x4e   : > { %695 = dma.done.wait (%p951_p4), [#allocation6], 512  }
  0x4f   : > { %697 = vsyncadd (%p951_p4), [#allocation6], 4294966784  ;;  %v730_v0 = vmov 0.0|0.0   ;;  %vm731_vm0 = vmmov 0   ;;  %v732_v1 = vmov 0.0   ;;  %s464_s23 = sshll.u32 %s716_s12, 3 }
  0x50   : > { %492 = vmatprep.subr.bf16.mxu0 %v730_v0  ;;  %495 = vmatprep.subr.bf16.mxu1 %v730_v0  ;;  %v192_v2 = vld [vmem:[#allocation5] sm:$0xff]  ;;  %v193_v3 = vld [vmem:[#allocation5 + $0x8] sm:$0xff]  ;;  %v271_v4 = vld [vmem:[#allocation5 + $0x10] sm:$0xff]  ;;  %s190_s24 = scalar_lea.vmem [#allocation2], %s464_s23  ;;  %vm194_vm1 = vcmask 130048   ;;  %s184_s27 = sand.u32 1, %s708_s10  }
  0x51   : > { %482 = vmatprep.mubr.msk.f32.mxu0 %vm731_vm0, %v732_v1  ;;  %489 = vmatprep.mubr.msk.f32.mxu1 %vm731_vm0, %v732_v1  ;;  %v493_v5 = vpack.c.bf16 %v193_v3, %v192_v2  ;;  %v272_v6 = vld [vmem:[#allocation5 + $0x18] sm:$0xff]  ;;  %v191_v8 = vld [vmem:[%s190_s24] sm:$0xff]  ;;  %s463_s29 = sshll.u32 %s184_s27, 4  ;;  %s469_s20 = sshll.u32 %s716_s12, 7 }
  0x52   : > { %v496_v7 = vpack.c.bf16 %v272_v6, %v271_v4  ;;  %s186_s16 = scalar_lea.vmem [#allocation7], %s463_s29  ;;  %s890_s30 = scalar_lea.hbm %s940_s2, %s469_s20 }
  0x53   : > { %494 = vmatpush3.bf16.msra.mxu0 %v493_v5  ;;  %s363_s18 = sshll.u32 %s186_s16, 4  ;;  %s892_s3 = scalar_lea.sflag [#allocation4], %s184_s27  ;;  %s885_s18 = int_to_ptr.vmem [resolvable:$true] %s363_s18 }
  0x54   : > { %497 = vmatpush3.bf16.msra.mxu1 %v496_v7  ;;  %s638_s12 = scalar_lea.vmem %s885_s18, 256  ;;  %p952_p1 = scmp.ne.s32.totalorder %s945_s19, 0 }
  0x55   : > { %p639_p13 = scmp.ne.s32.totalorder %s885_s18, %s638_s12  ;;  %s733_s4 = smov [#allocation7]  }
  0x56   : > { %483 = vmatmul.mubr.msk.f32.vlgmr.msra.gmra.mrb[0].mxu0 %vm194_vm1, %v191_v8  ;;  %s642_s5 = sshll.u32 %s733_s4, 4  ;;  %s643_s5 = int_to_ptr.vmem [resolvable:$false] %s642_s5 }
  0x57   : > { %490 = vmatmul.mubr.msk.f32.vlgmr.msra.gmra.mrb[0].mxu1 %vm194_vm1, %v191_v8  ;;  %p640_p8 = pnand %p639_p13, %p952_p1  ;;  %s644_s6 = scalar_lea.vmem %s643_s5, 512 }
  0x58   : > { %p645_p11 = scmp.lt.s32.totalorder %s885_s18, %s643_s5  ;;  %p646_p2 = scmp.lt.s32.totalorder %s644_s6, %s638_s12 }
  0x59   : > { %p641_p10 = pneg %p640_p8 }
  0x5a   : > { %p647_p3 = por %p646_p2, %p645_p11 }
  0x5c   : > { %p648_p5 = pnand %p647_p3, %p641_p10 }
 0x129   : > { %v264_v9 = vpop.f32.mrb[0].mxu0 }
 0x12a   : > { %v268_v10 = vmul.f32 0.2, %v264_v9  ;;  %v339_v11 = vpop.f32.mrb[0].mxu1  ;;  %v484_v12 = vpop.f32.mrb[1].mxu0 }
 0x12b   : > { %v343_v13 = vmul.f32 0.2, %v339_v11  ;;  %v491_v14 = vpop.f32.mrb[1].mxu1 }
 0x12c   : > { %269 = vst [vmem:[%s186_s16] sm:$0xff] %v268_v10 }
 0x12d   : > { %467 = vst [vmem:[%s186_s16 + $0x8] sm:$0xff] %v343_v13 }
 0x12e   : > { %651 = shalt.err (!%p648_p5)
}
 0x12f   : > { %s652_s7 = scalar_lea.hbm %s890_s30, 256  ;;  %s656_s15 = scalar_lea.hbm %s940_s2, 512 }
 0x130   : > { %p653_p6 = scmp.ne.s32.totalorder %s890_s30, %s652_s7  ;;  %p657_p12 = scmp.lt.u32.totalorder %s890_s30, %s940_s2 }
 0x131   : > { %p658_p0 = scmp.lt.u32.totalorder %s656_s15, %s652_s7  ;;  %p660_p13 = scmp.lt.u32.totalorder %s652_s7, %s890_s30 }
 0x132   : > { %p654_p7 = pnand %p653_p6, %p952_p1 }
 0x133   : > { %p659_p4 = por %p658_p0, %p657_p12 }
 0x134   : > { %p655_p9 = pneg %p654_p7 }
 0x135   : > { %p661_p8 = por %p660_p13, %p659_p4 }
 0x137   : > { %p662_p10 = pnand %p661_p8, %p655_p9 }
 0x139   : > { %665 = shalt.err (!%p662_p10)
}
 0x13a   : > { %s734_s27 = smov 128   ;;  %s735_s29 = smov 256  }
 0x13b   : > { %s736_s16 = smov 8  }
 0x13c   : > { %506 = dma.vmem_to_hbm [thread:$0]  (%p952_p1), %s885_s18, 256, %s890_s30, %s892_s3, %s734_s27, %s735_s29, %s736_s16  }
 0x13d PF: > { %p523_p11 = scmp.ge.s32.totalorder %s724_s14, 2  ;;  %s378_s20 = sand.u32 1, %s704_s9  }
 0x13e   : > { %p953_p2 = scmp.ne.s32.totalorder %s946_s21, 0  ;;  %s379_s25 = scalar_lea.sflag [#allocation4], %s378_s20 }
 0x140   : > { %p516_p3 = pnand %p523_p11, %p953_p2 }
 0x142   : > { %699 = dma.done.wait (!%p516_p3), %s379_s25, 256  }
 0x143   : > { %701 = vsyncadd (!%p516_p3), %s379_s25, 4294967040  ;;  %s17_s14 = sadd.s32 1, %s724_s14   ;;  %s954_s9 = smov %s708_s10 }
 0x144   : > { %p14_p5 = scmp.ge.s32.totalorder %s17_s14, 4   ;;  %s955_s10 = smov %s712_s11 }
 0x145   : > { %s956_s11 = smov %s805_s22  ;;  %s957_s12 = smov %s720_s13 }
 0x146   : > { %s958_s13 = smov %s960_s17  ;;  %16 = sbr.rel (!%p14_p5) target bundleno = 6 (0x6), region = 73 }
 0x14d   :  { %384 = vsyncpa [#allocation3], 1 }
 0x14e   :  { %386 = vsyncpa [#allocation3 + $0x1], 1 }
 0x14f   :  { %387 = vsyncpa [#allocation6], 1 }
 0x150   :  { %388 = vsyncpa [#allocation4], 1 }
 0x151   :  { %390 = vsyncpa [#allocation4 + $0x1], 1 }

</bundles_post_ra>
